<compile_context>
chip_gen: v6e
topology: v6e:2x2x1
jax: 0.10.0
libtpu: 0.0.40
codegen_flags: <defaults>
</compile_context>

<pallas_src>
import functools

import jax
import jax.numpy as jnp
from jax.experimental import pallas as pl
from jax.experimental.pallas import tpu as pltpu

BN_EPS = 1e-5
_INV_SQRT2 = 0.7071067811865476
_LANES = 128


def _gelu_exact(x):
    # nn.GELU() default (approximate='none'): 0.5*x*(1+erf(x/sqrt(2)))
    return 0.5 * x * (1.0 + jax.lax.erf(x * _INV_SQRT2))


def _round_up(n, m):
    return ((n + m - 1) // m) * m


def unet_up_kernel(xr_ref, sk_ref, me_ref, mp_ref, mn_ref, mv_ref,
                   wtx_ref, wts_ref, bt_ref, wc_ref, gamma_ref, beta_ref,
                   o_ref, *, n_valid):
    """Fused UnetUp forward on a batch-folded, lane-dense slab layout.

    xr_ref    : [Cx, P]            bf16  x, 2x lane-repeated + batch-folded + 0-padded
    sk_ref    : [Cs, P]            bf16  skip, same layout
    me_ref    : [1, P]             f32   1.0 on even output lanes (ConvT tap select)
    mp_ref    : [1, P]             f32   0.0 where (lane % L2) == 0       (tap-0 mask)
    mn_ref    : [1, P]             f32   0.0 where (lane % L2) == L2 - 1  (tap-2 mask)
    mv_ref    : [1, P]             f32   1.0 on the n_valid real lanes, 0 on padding
    wtx_ref   : [2, Cout, Cx]      bf16  ConvTranspose taps (x part)
    wts_ref   : [2, Cout, Cs]      bf16  ConvTranspose taps (skip part)
    bt_ref    : [Cout, 1]          f32   ConvTranspose bias
    wc_ref    : [4, 3, Cout, Cout] bf16  Conv1d(k=3) weights, [layer, tap, co, ci]
    gamma_ref : [4, Cout, 1]       f32   BatchNorm weight
    beta_ref  : [4, Cout, 1]       f32   BatchNorm bias
    o_ref     : [Cout, P]          f32   output slab (first n_valid lanes are real)
    """
    _, P = o_ref.shape
    f32, bf16 = jnp.float32, jnp.bfloat16

    m_even = me_ref[...]
    m_prev = mp_ref[...]
    m_next = mn_ref[...]
    m_valid = mv_ref[...]

    xr = xr_ref[...]
    sk = sk_ref[...]
    bt = bt_ref[...]

    # ---- ConvTranspose1d(kernel=2, stride=2) on the upsampled slab:
    # both taps are evaluated on every lane and merged by an even/odd select.
    z0 = (jnp.dot(wtx_ref[0], xr, preferred_element_type=f32) +
          jnp.dot(wts_ref[0], sk, preferred_element_type=f32))
    z1 = (jnp.dot(wtx_ref[1], xr, preferred_element_type=f32) +
          jnp.dot(wts_ref[1], sk, preferred_element_type=f32))
    y = (z0 * m_even + z1 * (1.0 - m_even) + bt).astype(bf16)   # [Cout, P]

    inv_n = 1.0 / float(n_valid)

    # ---- 4 x (Conv1d(k=3, s=1, p=1) -> BatchNorm1d(batch stats) -> exact GELU)
    # acc[:, l] = w0 @ y[:, l-1] + w1 @ y[:, l] + w2 @ y[:, l+1]
    # The +/-1 shifts are applied to the matmul *outputs* via pltpu.roll (XLU),
    # then zeroed at sample boundaries / batch seams / padding lanes.
    for layer in range(4):
        a0 = jnp.dot(wc_ref[layer, 0], y, preferred_element_type=f32)
        a1 = jnp.dot(wc_ref[layer, 1], y, preferred_element_type=f32)
        a2 = jnp.dot(wc_ref[layer, 2], y, preferred_element_type=f32)
        acc = (pltpu.roll(a0, 1, 1) * m_prev +          # a0 at lane l-1
               a1 +
               pltpu.roll(a2, P - 1, 1) * m_next        # a2 at lane l+1
               ) * m_valid                              # zero padding lanes
        # one-pass BN statistics (the conv bias cancels inside (x - mean))
        s = jnp.sum(acc, axis=1, keepdims=True)
        ss = jnp.sum(acc * acc, axis=1, keepdims=True)
        mean = s * inv_n
        var = jnp.maximum(ss * inv_n - mean * mean, 0.0)
        scale = gamma_ref[layer] * jax.lax.rsqrt(var + BN_EPS)  # [Cout, 1]
        shift = beta_ref[layer] - mean * scale                  # [Cout, 1]
        g = _gelu_exact(acc * scale + shift)                    # f32 [Cout, P]
        if layer < 3:
            y = g.astype(bf16)
        else:
            o_ref[...] = g


def _full_spec(shape):
    nd = len(shape)
    return pl.BlockSpec(shape, lambda *_: (0,) * nd)


def unet_up_pallas(x_ncl, skip_ncl, kparams):
    """x_ncl: [B, Cx, L], skip_ncl: [B, Cs, L] (PyTorch NCL); returns [B, Cout, 2L]."""
    wtx, wts, bt, wc, gamma, beta = kparams
    B, _, L = x_ncl.shape
    Cout = wtx.shape[1]
    L2 = 2 * L
    n_valid = B * L2
    P = _round_up(n_valid, _LANES)

    def fold_up(a):
        # [B, C, L] -> repeat each position twice -> [C, B*2L] -> pad lanes to P, bf16
        b, c, l = a.shape
        up = jnp.repeat(a, 2, axis=2)                              # [B, C, 2L]
        slab = jnp.transpose(up, (1, 0, 2)).reshape(c, b * 2 * l)  # [C, B*2L]
        if P > b * 2 * l:
            slab = jnp.pad(slab, ((0, 0), (0, P - b * 2 * l)))
        return slab.astype(jnp.bfloat16)

    xr = fold_up(x_ncl)
    sk = fold_up(skip_ncl)

    # Precomputed 0/1 masks (built once, DMA'd as tiny inputs).
    lane = jnp.arange(P, dtype=jnp.int32)
    pos = lane % L2
    m_even = ((lane % 2) == 0).astype(jnp.float32).reshape(1, P)
    m_prev = (pos != 0).astype(jnp.float32).reshape(1, P)
    m_next = (pos != (L2 - 1)).astype(jnp.float32).reshape(1, P)
    m_valid = (lane < n_valid).astype(jnp.float32).reshape(1, P)

    args = (xr, sk, m_even, m_prev, m_next, m_valid, wtx, wts, bt, wc, gamma, beta)
    out_sds = jax.ShapeDtypeStruct((Cout, P), jnp.float32)
    kernel = functools.partial(unet_up_kernel, n_valid=n_valid)
    out_slab = pl.pallas_call(
        kernel,
        out_shape=out_sds,
        grid=(1,),
        in_specs=[_full_spec(a.shape) for a in args],
        out_specs=_full_spec(out_sds.shape),
        compiler_params=pltpu.CompilerParams(
            dimension_semantics=("arbitrary",),
            vmem_limit_bytes=32 * 1024 * 1024),
    )(*args)
    # Unfold the lane-dense slab back to PyTorch NCL layout (cheap XLA relayout).
    out = out_slab[:, :n_valid].reshape(Cout, B, L2)
    return jnp.transpose(out, (1, 0, 2))


# --------------------------------------------------------------------------- #
# Parameters (PyTorch-layout) + one-time kernel re-layout / bf16 cast
# --------------------------------------------------------------------------- #
def init_module_params(key, in_channels, out_channels):
    ks = jax.random.split(key, 6)
    # ConvTranspose1d(Cin, Cout, 2, 2): weight [Cin, Cout, 2], bias [Cout]
    wt = 0.2 * jax.random.normal(ks[0], (in_channels, out_channels, 2), jnp.float32)
    bt = 0.1 * jax.random.normal(ks[1], (out_channels,), jnp.float32)
    # 4x Conv1d(Cout, Cout, 3, 1, 1): weight [Cout, Cout, 3], bias [Cout]
    wc = 0.2 * jax.random.normal(ks[2], (4, out_channels, out_channels, 3), jnp.float32)
    bc = 0.1 * jax.random.normal(ks[3], (4, out_channels), jnp.float32)
    # BatchNorm affine params (perturbed from default 1/0 so the fused
    # scale/shift path is actually exercised).
    gamma = 1.0 + 0.1 * jax.random.normal(ks[4], (4, out_channels), jnp.float32)
    beta = 0.1 * jax.random.normal(ks[5], (4, out_channels), jnp.float32)
    return wt, bt, wc, bc, gamma, beta


def prepare_kernel_params(params, cx):
    """One-time re-layout for the slab matmuls + bf16 cast of MXU operands.
    Conv biases are NOT passed: they cancel exactly inside the training-mode
    BatchNorm that immediately follows each conv."""
    wt, bt, wc, _bc, gamma, beta = params
    cout = wt.shape[1]
    wt_t = jnp.transpose(wt, (2, 1, 0))                           # [2, Cout, Cin]
    wtx = wt_t[:, :, :cx].astype(jnp.bfloat16)                    # [2, Cout, Cx]
    wts = wt_t[:, :, cx:].astype(jnp.bfloat16)                    # [2, Cout, Cs]
    bt_k = bt.reshape(cout, 1)                                    # [Cout, 1]
    wck = jnp.transpose(wc, (0, 3, 1, 2)).astype(jnp.bfloat16)    # [4, 3, Cout, Cout]
    gamma_k = gamma.reshape(4, cout, 1)
    beta_k = beta.reshape(4, cout, 1)
    return wtx, wts, bt_k, wck, gamma_k, beta_k


# --------------------------------------------------------------------------- #
# Pure-JAX reference (faithful to the PyTorch module; same bf16 matmul policy)
# --------------------------------------------------------------------------- #
def unet_up_reference(x, skip, params):
    wt, bt, wc, bc, gamma, beta = params
    xin = jnp.concatenate([x, skip], axis=1).astype(jnp.bfloat16)  # [B, Cin, L]
    B, _, L = xin.shape
    Cout = wt.shape[1]
    L2 = 2 * L

    # ConvTranspose1d(k=2, s=2): out[b, o, 2t+k] = sum_c xin[b,c,t]*wt[c,o,k] + bt
    y = jnp.einsum('bct,cok->bokt', xin, wt.astype(jnp.bfloat16),
                   preferred_element_type=jnp.float32)
    y = jnp.transpose(y, (0, 1, 3, 2)).reshape(B, Cout, L2) + bt[None, :, None]

    for layer in range(4):
        wl = wc[layer].astype(jnp.bfloat16)                        # [Cout, Ci, 3]
        yp = jnp.pad(y, ((0, 0), (0, 0), (1, 1))).astype(jnp.bfloat16)
        win = jnp.stack([yp[:, :, k:k + L2] for k in range(3)], axis=2)
        conv = jnp.einsum('oik,bikl->bol', wl, win,
                          preferred_element_type=jnp.float32)
        conv = conv + bc[layer][None, :, None]
        # BatchNorm1d forward in training mode: batch mean / biased variance.
        mean = jnp.mean(conv, axis=(0, 2), keepdims=True)
        var = jnp.mean((conv - mean) ** 2, axis=(0, 2), keepdims=True)
        h = (conv - mean) * jax.lax.rsqrt(var + BN_EPS)
        h = h * gamma[layer][None, :, None] + beta[layer][None, :, None]
        y = _gelu_exact(h)
    return y


# TODO(synk): training-mode BatchNorm running_mean/running_var state updates are
# not produced (only the forward activation, which is all the module returns).
if __name__ == "__main__":
    # UnetUp(in_channels=8, out_channels=4) with x: [2, 4, 8], skip: [2, 4, 8]
    # (the module concatenates x and skip along channels) -> output [2, 4, 16].
    B, Cx, Cs, L = 2, 4, 4, 8
    in_channels, out_channels = Cx + Cs, 4

    key = jax.random.PRNGKey(0)
    kx, ks, kp = jax.random.split(key, 3)
    x = jax.random.normal(kx, (B, Cx, L), jnp.float32)
    skip = jax.random.normal(ks, (B, Cs, L), jnp.float32)

    params = init_module_params(kp, in_channels, out_channels)
    kparams = prepare_kernel_params(params, Cx)

    out = unet_up_pallas(x, skip, kparams)
    out = jax.block_until_ready(out)
    assert out.shape == (B, out_channels, 2 * L), out.shape

    ref = unet_up_reference(x, skip, params)
    err = float(jnp.max(jnp.abs(out - ref)))
    assert err < 2e-2, f"max abs err vs reference: {err}"

    print("KERNEL_OK")
</pallas_src>

<mosaic_0001>
module attributes {stable_mosaic.version = 11 : i64} {
  func.func @unet_up_kernel(%arg0: i32, %arg1: memref<4x128xbf16, #tpu.memory_space<vmem>>, %arg2: memref<4x128xbf16, #tpu.memory_space<vmem>>, %arg3: memref<1x128xf32, #tpu.memory_space<vmem>>, %arg4: memref<1x128xf32, #tpu.memory_space<vmem>>, %arg5: memref<1x128xf32, #tpu.memory_space<vmem>>, %arg6: memref<1x128xf32, #tpu.memory_space<vmem>>, %arg7: memref<2x4x4xbf16, #tpu.memory_space<vmem>>, %arg8: memref<2x4x4xbf16, #tpu.memory_space<vmem>>, %arg9: memref<4x1xf32, #tpu.memory_space<vmem>>, %arg10: memref<4x3x4x4xbf16, #tpu.memory_space<vmem>>, %arg11: memref<4x4x1xf32, #tpu.memory_space<vmem>>, %arg12: memref<4x4x1xf32, #tpu.memory_space<vmem>>, %arg13: memref<4x128xf32, #tpu.memory_space<vmem>>) attributes {dimension_semantics = [#tpu.dimension_semantics<arbitrary>], iteration_bounds = array<i64: 1>, scalar_prefetch = 0 : i64, scratch_operands = 0 : i64, tpu.core_type = #tpu.core_type<tc>, window_params = [{pipeline_mode = #tpu.pipeline_mode<synchronous>, transform_indices = @transform_0, window_bounds = array<i64: 4, 128>}, {pipeline_mode = #tpu.pipeline_mode<synchronous>, transform_indices = @transform_1, window_bounds = array<i64: 4, 128>}, {pipeline_mode = #tpu.pipeline_mode<synchronous>, transform_indices = @transform_2, window_bounds = array<i64: 1, 128>}, {pipeline_mode = #tpu.pipeline_mode<synchronous>, transform_indices = @transform_3, window_bounds = array<i64: 1, 128>}, {pipeline_mode = #tpu.pipeline_mode<synchronous>, transform_indices = @transform_4, window_bounds = array<i64: 1, 128>}, {pipeline_mode = #tpu.pipeline_mode<synchronous>, transform_indices = @transform_5, window_bounds = array<i64: 1, 128>}, {pipeline_mode = #tpu.pipeline_mode<synchronous>, transform_indices = @transform_6, window_bounds = array<i64: 2, 4, 4>}, {pipeline_mode = #tpu.pipeline_mode<synchronous>, transform_indices = @transform_7, window_bounds = array<i64: 2, 4, 4>}, {pipeline_mode = #tpu.pipeline_mode<synchronous>, transform_indices = @transform_8, window_bounds = array<i64: 4, 1>}, {pipeline_mode = #tpu.pipeline_mode<synchronous>, transform_indices = @transform_9, window_bounds = array<i64: 4, 3, 4, 4>}, {pipeline_mode = #tpu.pipeline_mode<synchronous>, transform_indices = @transform_10, window_bounds = array<i64: 4, 4, 1>}, {pipeline_mode = #tpu.pipeline_mode<synchronous>, transform_indices = @transform_11, window_bounds = array<i64: 4, 4, 1>}, {pipeline_mode = #tpu.pipeline_mode<synchronous>, transform_indices = @transform_12, window_bounds = array<i64: 4, 128>}]} {
    %c0 = arith.constant 0 : index
    %c0_0 = arith.constant 0 : index
    %0 = vector.load %arg3[%c0, %c0_0] : memref<1x128xf32, #tpu.memory_space<vmem>>, vector<1x128xf32>
    %c0_1 = arith.constant 0 : index
    %c0_2 = arith.constant 0 : index
    %1 = vector.load %arg4[%c0_1, %c0_2] : memref<1x128xf32, #tpu.memory_space<vmem>>, vector<1x128xf32>
    %c0_3 = arith.constant 0 : index
    %c0_4 = arith.constant 0 : index
    %2 = vector.load %arg5[%c0_3, %c0_4] : memref<1x128xf32, #tpu.memory_space<vmem>>, vector<1x128xf32>
    %c0_5 = arith.constant 0 : index
    %c0_6 = arith.constant 0 : index
    %3 = vector.load %arg6[%c0_5, %c0_6] : memref<1x128xf32, #tpu.memory_space<vmem>>, vector<1x128xf32>
    %c0_7 = arith.constant 0 : index
    %c0_8 = arith.constant 0 : index
    %4 = vector.load %arg1[%c0_7, %c0_8] : memref<4x128xbf16, #tpu.memory_space<vmem>>, vector<4x128xbf16>
    %c0_9 = arith.constant 0 : index
    %c0_10 = arith.constant 0 : index
    %5 = vector.load %arg2[%c0_9, %c0_10] : memref<4x128xbf16, #tpu.memory_space<vmem>>, vector<4x128xbf16>
    %c0_11 = arith.constant 0 : index
    %c0_12 = arith.constant 0 : index
    %6 = vector.load %arg9[%c0_11, %c0_12] : memref<4x1xf32, #tpu.memory_space<vmem>>, vector<4x1xf32>
    %c0_13 = arith.constant 0 : index
    %c0_14 = arith.constant 0 : index
    %c0_15 = arith.constant 0 : index
    %7 = vector.load %arg7[%c0_13, %c0_14, %c0_15] : memref<2x4x4xbf16, #tpu.memory_space<vmem>>, vector<1x4x4xbf16>
    %8 = vector.shape_cast %7 : vector<1x4x4xbf16> to vector<4x4xbf16>
    %cst = arith.constant dense<0.000000e+00> : vector<4x128xf32>
    %9 = tpu.matmul %8, %4, %cst {dimension_numbers = #tpu.dot_dimension_numbers<[1], [0], [0], [1], [0, 0, 1, 1], [], []>} : vector<4x4xbf16>, vector<4x128xbf16>, vector<4x128xf32> -> vector<4x128xf32>
    %c0_16 = arith.constant 0 : index
    %c0_17 = arith.constant 0 : index
    %c0_18 = arith.constant 0 : index
    %10 = vector.load %arg8[%c0_16, %c0_17, %c0_18] : memref<2x4x4xbf16, #tpu.memory_space<vmem>>, vector<1x4x4xbf16>
    %11 = vector.shape_cast %10 : vector<1x4x4xbf16> to vector<4x4xbf16>
    %cst_19 = arith.constant dense<0.000000e+00> : vector<4x128xf32>
    %12 = tpu.matmul %11, %5, %cst_19 {dimension_numbers = #tpu.dot_dimension_numbers<[1], [0], [0], [1], [0, 0, 1, 1], [], []>} : vector<4x4xbf16>, vector<4x128xbf16>, vector<4x128xf32> -> vector<4x128xf32>
    %13 = arith.addf %9, %12 : vector<4x128xf32>
    %c1 = arith.constant 1 : index
    %c0_20 = arith.constant 0 : index
    %c0_21 = arith.constant 0 : index
    %14 = vector.load %arg7[%c1, %c0_20, %c0_21] : memref<2x4x4xbf16, #tpu.memory_space<vmem>>, vector<1x4x4xbf16>
    %15 = vector.shape_cast %14 : vector<1x4x4xbf16> to vector<4x4xbf16>
    %cst_22 = arith.constant dense<0.000000e+00> : vector<4x128xf32>
    %16 = tpu.matmul %15, %4, %cst_22 {dimension_numbers = #tpu.dot_dimension_numbers<[1], [0], [0], [1], [0, 0, 1, 1], [], []>} : vector<4x4xbf16>, vector<4x128xbf16>, vector<4x128xf32> -> vector<4x128xf32>
    %c1_23 = arith.constant 1 : index
    %c0_24 = arith.constant 0 : index
    %c0_25 = arith.constant 0 : index
    %17 = vector.load %arg8[%c1_23, %c0_24, %c0_25] : memref<2x4x4xbf16, #tpu.memory_space<vmem>>, vector<1x4x4xbf16>
    %18 = vector.shape_cast %17 : vector<1x4x4xbf16> to vector<4x4xbf16>
    %cst_26 = arith.constant dense<0.000000e+00> : vector<4x128xf32>
    %19 = tpu.matmul %18, %5, %cst_26 {dimension_numbers = #tpu.dot_dimension_numbers<[1], [0], [0], [1], [0, 0, 1, 1], [], []>} : vector<4x4xbf16>, vector<4x128xbf16>, vector<4x128xf32> -> vector<4x128xf32>
    %20 = arith.addf %16, %19 : vector<4x128xf32>
    %21 = vector.broadcast %0 : vector<1x128xf32> to vector<4x128xf32>
    %22 = arith.mulf %13, %21 : vector<4x128xf32>
    %cst_27 = arith.constant 1.000000e+00 : f32
    %23 = vector.broadcast %cst_27 : f32 to vector<1x128xf32>
    %24 = arith.subf %23, %0 : vector<1x128xf32>
    %25 = vector.broadcast %24 : vector<1x128xf32> to vector<4x128xf32>
    %26 = arith.mulf %20, %25 : vector<4x128xf32>
    %27 = arith.addf %22, %26 : vector<4x128xf32>
    %28 = vector.broadcast %6 : vector<4x1xf32> to vector<4x128xf32>
    %29 = arith.addf %27, %28 : vector<4x128xf32>
    %30 = arith.truncf %29 : vector<4x128xf32> to vector<4x128xbf16>
    %c0_28 = arith.constant 0 : index
    %c0_29 = arith.constant 0 : index
    %c0_30 = arith.constant 0 : index
    %c0_31 = arith.constant 0 : index
    %31 = vector.load %arg10[%c0_28, %c0_29, %c0_30, %c0_31] : memref<4x3x4x4xbf16, #tpu.memory_space<vmem>>, vector<1x1x4x4xbf16>
    %32 = vector.shape_cast %31 : vector<1x1x4x4xbf16> to vector<4x4xbf16>
    %cst_32 = arith.constant dense<0.000000e+00> : vector<4x128xf32>
    %33 = tpu.matmul %32, %30, %cst_32 {dimension_numbers = #tpu.dot_dimension_numbers<[1], [0], [0], [1], [0, 0, 1, 1], [], []>} : vector<4x4xbf16>, vector<4x128xbf16>, vector<4x128xf32> -> vector<4x128xf32>
    %c0_33 = arith.constant 0 : index
    %c1_34 = arith.constant 1 : index
    %c0_35 = arith.constant 0 : index
    %c0_36 = arith.constant 0 : index
    %34 = vector.load %arg10[%c0_33, %c1_34, %c0_35, %c0_36] : memref<4x3x4x4xbf16, #tpu.memory_space<vmem>>, vector<1x1x4x4xbf16>
    %35 = vector.shape_cast %34 : vector<1x1x4x4xbf16> to vector<4x4xbf16>
    %cst_37 = arith.constant dense<0.000000e+00> : vector<4x128xf32>
    %36 = tpu.matmul %35, %30, %cst_37 {dimension_numbers = #tpu.dot_dimension_numbers<[1], [0], [0], [1], [0, 0, 1, 1], [], []>} : vector<4x4xbf16>, vector<4x128xbf16>, vector<4x128xf32> -> vector<4x128xf32>
    %c0_38 = arith.constant 0 : index
    %c2 = arith.constant 2 : index
    %c0_39 = arith.constant 0 : index
    %c0_40 = arith.constant 0 : index
    %37 = vector.load %arg10[%c0_38, %c2, %c0_39, %c0_40] : memref<4x3x4x4xbf16, #tpu.memory_space<vmem>>, vector<1x1x4x4xbf16>
    %38 = vector.shape_cast %37 : vector<1x1x4x4xbf16> to vector<4x4xbf16>
    %cst_41 = arith.constant dense<0.000000e+00> : vector<4x128xf32>
    %39 = tpu.matmul %38, %30, %cst_41 {dimension_numbers = #tpu.dot_dimension_numbers<[1], [0], [0], [1], [0, 0, 1, 1], [], []>} : vector<4x4xbf16>, vector<4x128xbf16>, vector<4x128xf32> -> vector<4x128xf32>
    %c1_i32 = arith.constant 1 : i32
    %40 = tpu.dynamic_rotate %33 by %c1_i32 dim 1 : vector<4x128xf32>, i32 -> vector<4x128xf32>
    %41 = vector.broadcast %1 : vector<1x128xf32> to vector<4x128xf32>
    %42 = arith.mulf %40, %41 : vector<4x128xf32>
    %43 = arith.addf %42, %36 : vector<4x128xf32>
    %c127_i32 = arith.constant 127 : i32
    %44 = tpu.dynamic_rotate %39 by %c127_i32 dim 1 : vector<4x128xf32>, i32 -> vector<4x128xf32>
    %45 = vector.broadcast %2 : vector<1x128xf32> to vector<4x128xf32>
    %46 = arith.mulf %44, %45 : vector<4x128xf32>
    %47 = arith.addf %43, %46 : vector<4x128xf32>
    %48 = vector.broadcast %3 : vector<1x128xf32> to vector<4x128xf32>
    %49 = arith.mulf %47, %48 : vector<4x128xf32>
    %cst_42 = arith.constant dense<0.000000e+00> : vector<4xf32>
    %50 = vector.multi_reduction <add>, %49, %cst_42 [1] : vector<4x128xf32> to vector<4xf32>
    %51 = vector.shape_cast %50 : vector<4xf32> to vector<4x1xf32>
    %52 = arith.mulf %49, %49 : vector<4x128xf32>
    %cst_43 = arith.constant dense<0.000000e+00> : vector<4xf32>
    %53 = vector.multi_reduction <add>, %52, %cst_43 [1] : vector<4x128xf32> to vector<4xf32>
    %54 = vector.shape_cast %53 : vector<4xf32> to vector<4x1xf32>
    %cst_44 = arith.constant 3.125000e-02 : f32
    %55 = vector.broadcast %cst_44 : f32 to vector<4x1xf32>
    %56 = arith.mulf %51, %55 : vector<4x1xf32>
    %cst_45 = arith.constant 3.125000e-02 : f32
    %57 = vector.broadcast %cst_45 : f32 to vector<4x1xf32>
    %58 = arith.mulf %54, %57 : vector<4x1xf32>
    %59 = arith.mulf %56, %56 : vector<4x1xf32>
    %60 = arith.subf %58, %59 : vector<4x1xf32>
    %cst_46 = arith.constant 0.000000e+00 : f32
    %61 = vector.broadcast %cst_46 : f32 to vector<4x1xf32>
    %62 = arith.maximumf %60, %61 : vector<4x1xf32>
    %c0_47 = arith.constant 0 : index
    %c0_48 = arith.constant 0 : index
    %c0_49 = arith.constant 0 : index
    %63 = vector.load %arg11[%c0_47, %c0_48, %c0_49] : memref<4x4x1xf32, #tpu.memory_space<vmem>>, vector<1x4x1xf32>
    %64 = vector.shape_cast %63 : vector<1x4x1xf32> to vector<4x1xf32>
    %cst_50 = arith.constant 9.99999974E-6 : f32
    %65 = vector.broadcast %cst_50 : f32 to vector<4x1xf32>
    %66 = arith.addf %62, %65 : vector<4x1xf32>
    %67 = math.rsqrt %66 : vector<4x1xf32>
    %68 = arith.mulf %64, %67 : vector<4x1xf32>
    %c0_51 = arith.constant 0 : index
    %c0_52 = arith.constant 0 : index
    %c0_53 = arith.constant 0 : index
    %69 = vector.load %arg12[%c0_51, %c0_52, %c0_53] : memref<4x4x1xf32, #tpu.memory_space<vmem>>, vector<1x4x1xf32>
    %70 = vector.shape_cast %69 : vector<1x4x1xf32> to vector<4x1xf32>
    %71 = arith.mulf %56, %68 : vector<4x1xf32>
    %72 = arith.subf %70, %71 : vector<4x1xf32>
    %73 = vector.broadcast %68 : vector<4x1xf32> to vector<4x128xf32>
    %74 = arith.mulf %49, %73 : vector<4x128xf32>
    %75 = vector.broadcast %72 : vector<4x1xf32> to vector<4x128xf32>
    %76 = arith.addf %74, %75 : vector<4x128xf32>
    %cst_54 = arith.constant 5.000000e-01 : f32
    %77 = vector.broadcast %cst_54 : f32 to vector<4x128xf32>
    %78 = arith.mulf %77, %76 : vector<4x128xf32>
    %cst_55 = arith.constant 0.707106769 : f32
    %79 = vector.broadcast %cst_55 : f32 to vector<4x128xf32>
    %80 = arith.mulf %76, %79 : vector<4x128xf32>
    %81 = math.erf %80 : vector<4x128xf32>
    %cst_56 = arith.constant 1.000000e+00 : f32
    %82 = vector.broadcast %cst_56 : f32 to vector<4x128xf32>
    %83 = arith.addf %82, %81 : vector<4x128xf32>
    %84 = arith.mulf %78, %83 : vector<4x128xf32>
    %85 = arith.truncf %84 : vector<4x128xf32> to vector<4x128xbf16>
    %c1_57 = arith.constant 1 : index
    %c0_58 = arith.constant 0 : index
    %c0_59 = arith.constant 0 : index
    %c0_60 = arith.constant 0 : index
    %86 = vector.load %arg10[%c1_57, %c0_58, %c0_59, %c0_60] : memref<4x3x4x4xbf16, #tpu.memory_space<vmem>>, vector<1x1x4x4xbf16>
    %87 = vector.shape_cast %86 : vector<1x1x4x4xbf16> to vector<4x4xbf16>
    %cst_61 = arith.constant dense<0.000000e+00> : vector<4x128xf32>
    %88 = tpu.matmul %87, %85, %cst_61 {dimension_numbers = #tpu.dot_dimension_numbers<[1], [0], [0], [1], [0, 0, 1, 1], [], []>} : vector<4x4xbf16>, vector<4x128xbf16>, vector<4x128xf32> -> vector<4x128xf32>
    %c1_62 = arith.constant 1 : index
    %c1_63 = arith.constant 1 : index
    %c0_64 = arith.constant 0 : index
    %c0_65 = arith.constant 0 : index
    %89 = vector.load %arg10[%c1_62, %c1_63, %c0_64, %c0_65] : memref<4x3x4x4xbf16, #tpu.memory_space<vmem>>, vector<1x1x4x4xbf16>
    %90 = vector.shape_cast %89 : vector<1x1x4x4xbf16> to vector<4x4xbf16>
    %cst_66 = arith.constant dense<0.000000e+00> : vector<4x128xf32>
    %91 = tpu.matmul %90, %85, %cst_66 {dimension_numbers = #tpu.dot_dimension_numbers<[1], [0], [0], [1], [0, 0, 1, 1], [], []>} : vector<4x4xbf16>, vector<4x128xbf16>, vector<4x128xf32> -> vector<4x128xf32>
    %c1_67 = arith.constant 1 : index
    %c2_68 = arith.constant 2 : index
    %c0_69 = arith.constant 0 : index
    %c0_70 = arith.constant 0 : index
    %92 = vector.load %arg10[%c1_67, %c2_68, %c0_69, %c0_70] : memref<4x3x4x4xbf16, #tpu.memory_space<vmem>>, vector<1x1x4x4xbf16>
    %93 = vector.shape_cast %92 : vector<1x1x4x4xbf16> to vector<4x4xbf16>
    %cst_71 = arith.constant dense<0.000000e+00> : vector<4x128xf32>
    %94 = tpu.matmul %93, %85, %cst_71 {dimension_numbers = #tpu.dot_dimension_numbers<[1], [0], [0], [1], [0, 0, 1, 1], [], []>} : vector<4x4xbf16>, vector<4x128xbf16>, vector<4x128xf32> -> vector<4x128xf32>
    %c1_i32_72 = arith.constant 1 : i32
    %95 = tpu.dynamic_rotate %88 by %c1_i32_72 dim 1 : vector<4x128xf32>, i32 -> vector<4x128xf32>
    %96 = vector.broadcast %1 : vector<1x128xf32> to vector<4x128xf32>
    %97 = arith.mulf %95, %96 : vector<4x128xf32>
    %98 = arith.addf %97, %91 : vector<4x128xf32>
    %c127_i32_73 = arith.constant 127 : i32
    %99 = tpu.dynamic_rotate %94 by %c127_i32_73 dim 1 : vector<4x128xf32>, i32 -> vector<4x128xf32>
    %100 = vector.broadcast %2 : vector<1x128xf32> to vector<4x128xf32>
    %101 = arith.mulf %99, %100 : vector<4x128xf32>
    %102 = arith.addf %98, %101 : vector<4x128xf32>
    %103 = vector.broadcast %3 : vector<1x128xf32> to vector<4x128xf32>
    %104 = arith.mulf %102, %103 : vector<4x128xf32>
    %cst_74 = arith.constant dense<0.000000e+00> : vector<4xf32>
    %105 = vector.multi_reduction <add>, %104, %cst_74 [1] : vector<4x128xf32> to vector<4xf32>
    %106 = vector.shape_cast %105 : vector<4xf32> to vector<4x1xf32>
    %107 = arith.mulf %104, %104 : vector<4x128xf32>
    %cst_75 = arith.constant dense<0.000000e+00> : vector<4xf32>
    %108 = vector.multi_reduction <add>, %107, %cst_75 [1] : vector<4x128xf32> to vector<4xf32>
    %109 = vector.shape_cast %108 : vector<4xf32> to vector<4x1xf32>
    %cst_76 = arith.constant 3.125000e-02 : f32
    %110 = vector.broadcast %cst_76 : f32 to vector<4x1xf32>
    %111 = arith.mulf %106, %110 : vector<4x1xf32>
    %cst_77 = arith.constant 3.125000e-02 : f32
    %112 = vector.broadcast %cst_77 : f32 to vector<4x1xf32>
    %113 = arith.mulf %109, %112 : vector<4x1xf32>
    %114 = arith.mulf %111, %111 : vector<4x1xf32>
    %115 = arith.subf %113, %114 : vector<4x1xf32>
    %cst_78 = arith.constant 0.000000e+00 : f32
    %116 = vector.broadcast %cst_78 : f32 to vector<4x1xf32>
    %117 = arith.maximumf %115, %116 : vector<4x1xf32>
    %c1_79 = arith.constant 1 : index
    %c0_80 = arith.constant 0 : index
    %c0_81 = arith.constant 0 : index
    %118 = vector.load %arg11[%c1_79, %c0_80, %c0_81] : memref<4x4x1xf32, #tpu.memory_space<vmem>>, vector<1x4x1xf32>
    %119 = vector.shape_cast %118 : vector<1x4x1xf32> to vector<4x1xf32>
    %cst_82 = arith.constant 9.99999974E-6 : f32
    %120 = vector.broadcast %cst_82 : f32 to vector<4x1xf32>
    %121 = arith.addf %117, %120 : vector<4x1xf32>
    %122 = math.rsqrt %121 : vector<4x1xf32>
    %123 = arith.mulf %119, %122 : vector<4x1xf32>
    %c1_83 = arith.constant 1 : index
    %c0_84 = arith.constant 0 : index
    %c0_85 = arith.constant 0 : index
    %124 = vector.load %arg12[%c1_83, %c0_84, %c0_85] : memref<4x4x1xf32, #tpu.memory_space<vmem>>, vector<1x4x1xf32>
    %125 = vector.shape_cast %124 : vector<1x4x1xf32> to vector<4x1xf32>
    %126 = arith.mulf %111, %123 : vector<4x1xf32>
    %127 = arith.subf %125, %126 : vector<4x1xf32>
    %128 = vector.broadcast %123 : vector<4x1xf32> to vector<4x128xf32>
    %129 = arith.mulf %104, %128 : vector<4x128xf32>
    %130 = vector.broadcast %127 : vector<4x1xf32> to vector<4x128xf32>
    %131 = arith.addf %129, %130 : vector<4x128xf32>
    %cst_86 = arith.constant 5.000000e-01 : f32
    %132 = vector.broadcast %cst_86 : f32 to vector<4x128xf32>
    %133 = arith.mulf %132, %131 : vector<4x128xf32>
    %cst_87 = arith.constant 0.707106769 : f32
    %134 = vector.broadcast %cst_87 : f32 to vector<4x128xf32>
    %135 = arith.mulf %131, %134 : vector<4x128xf32>
    %136 = math.erf %135 : vector<4x128xf32>
    %cst_88 = arith.constant 1.000000e+00 : f32
    %137 = vector.broadcast %cst_88 : f32 to vector<4x128xf32>
    %138 = arith.addf %137, %136 : vector<4x128xf32>
    %139 = arith.mulf %133, %138 : vector<4x128xf32>
    %140 = arith.truncf %139 : vector<4x128xf32> to vector<4x128xbf16>
    %c2_89 = arith.constant 2 : index
    %c0_90 = arith.constant 0 : index
    %c0_91 = arith.constant 0 : index
    %c0_92 = arith.constant 0 : index
    %141 = vector.load %arg10[%c2_89, %c0_90, %c0_91, %c0_92] : memref<4x3x4x4xbf16, #tpu.memory_space<vmem>>, vector<1x1x4x4xbf16>
    %142 = vector.shape_cast %141 : vector<1x1x4x4xbf16> to vector<4x4xbf16>
    %cst_93 = arith.constant dense<0.000000e+00> : vector<4x128xf32>
    %143 = tpu.matmul %142, %140, %cst_93 {dimension_numbers = #tpu.dot_dimension_numbers<[1], [0], [0], [1], [0, 0, 1, 1], [], []>} : vector<4x4xbf16>, vector<4x128xbf16>, vector<4x128xf32> -> vector<4x128xf32>
    %c2_94 = arith.constant 2 : index
    %c1_95 = arith.constant 1 : index
    %c0_96 = arith.constant 0 : index
    %c0_97 = arith.constant 0 : index
    %144 = vector.load %arg10[%c2_94, %c1_95, %c0_96, %c0_97] : memref<4x3x4x4xbf16, #tpu.memory_space<vmem>>, vector<1x1x4x4xbf16>
    %145 = vector.shape_cast %144 : vector<1x1x4x4xbf16> to vector<4x4xbf16>
    %cst_98 = arith.constant dense<0.000000e+00> : vector<4x128xf32>
    %146 = tpu.matmul %145, %140, %cst_98 {dimension_numbers = #tpu.dot_dimension_numbers<[1], [0], [0], [1], [0, 0, 1, 1], [], []>} : vector<4x4xbf16>, vector<4x128xbf16>, vector<4x128xf32> -> vector<4x128xf32>
    %c2_99 = arith.constant 2 : index
    %c2_100 = arith.constant 2 : index
    %c0_101 = arith.constant 0 : index
    %c0_102 = arith.constant 0 : index
    %147 = vector.load %arg10[%c2_99, %c2_100, %c0_101, %c0_102] : memref<4x3x4x4xbf16, #tpu.memory_space<vmem>>, vector<1x1x4x4xbf16>
    %148 = vector.shape_cast %147 : vector<1x1x4x4xbf16> to vector<4x4xbf16>
    %cst_103 = arith.constant dense<0.000000e+00> : vector<4x128xf32>
    %149 = tpu.matmul %148, %140, %cst_103 {dimension_numbers = #tpu.dot_dimension_numbers<[1], [0], [0], [1], [0, 0, 1, 1], [], []>} : vector<4x4xbf16>, vector<4x128xbf16>, vector<4x128xf32> -> vector<4x128xf32>
    %c1_i32_104 = arith.constant 1 : i32
    %150 = tpu.dynamic_rotate %143 by %c1_i32_104 dim 1 : vector<4x128xf32>, i32 -> vector<4x128xf32>
    %151 = vector.broadcast %1 : vector<1x128xf32> to vector<4x128xf32>
    %152 = arith.mulf %150, %151 : vector<4x128xf32>
    %153 = arith.addf %152, %146 : vector<4x128xf32>
    %c127_i32_105 = arith.constant 127 : i32
    %154 = tpu.dynamic_rotate %149 by %c127_i32_105 dim 1 : vector<4x128xf32>, i32 -> vector<4x128xf32>
    %155 = vector.broadcast %2 : vector<1x128xf32> to vector<4x128xf32>
    %156 = arith.mulf %154, %155 : vector<4x128xf32>
    %157 = arith.addf %153, %156 : vector<4x128xf32>
    %158 = vector.broadcast %3 : vector<1x128xf32> to vector<4x128xf32>
    %159 = arith.mulf %157, %158 : vector<4x128xf32>
    %cst_106 = arith.constant dense<0.000000e+00> : vector<4xf32>
    %160 = vector.multi_reduction <add>, %159, %cst_106 [1] : vector<4x128xf32> to vector<4xf32>
    %161 = vector.shape_cast %160 : vector<4xf32> to vector<4x1xf32>
    %162 = arith.mulf %159, %159 : vector<4x128xf32>
    %cst_107 = arith.constant dense<0.000000e+00> : vector<4xf32>
    %163 = vector.multi_reduction <add>, %162, %cst_107 [1] : vector<4x128xf32> to vector<4xf32>
    %164 = vector.shape_cast %163 : vector<4xf32> to vector<4x1xf32>
    %cst_108 = arith.constant 3.125000e-02 : f32
    %165 = vector.broadcast %cst_108 : f32 to vector<4x1xf32>
    %166 = arith.mulf %161, %165 : vector<4x1xf32>
    %cst_109 = arith.constant 3.125000e-02 : f32
    %167 = vector.broadcast %cst_109 : f32 to vector<4x1xf32>
    %168 = arith.mulf %164, %167 : vector<4x1xf32>
    %169 = arith.mulf %166, %166 : vector<4x1xf32>
    %170 = arith.subf %168, %169 : vector<4x1xf32>
    %cst_110 = arith.constant 0.000000e+00 : f32
    %171 = vector.broadcast %cst_110 : f32 to vector<4x1xf32>
    %172 = arith.maximumf %170, %171 : vector<4x1xf32>
    %c2_111 = arith.constant 2 : index
    %c0_112 = arith.constant 0 : index
    %c0_113 = arith.constant 0 : index
    %173 = vector.load %arg11[%c2_111, %c0_112, %c0_113] : memref<4x4x1xf32, #tpu.memory_space<vmem>>, vector<1x4x1xf32>
    %174 = vector.shape_cast %173 : vector<1x4x1xf32> to vector<4x1xf32>
    %cst_114 = arith.constant 9.99999974E-6 : f32
    %175 = vector.broadcast %cst_114 : f32 to vector<4x1xf32>
    %176 = arith.addf %172, %175 : vector<4x1xf32>
    %177 = math.rsqrt %176 : vector<4x1xf32>
    %178 = arith.mulf %174, %177 : vector<4x1xf32>
    %c2_115 = arith.constant 2 : index
    %c0_116 = arith.constant 0 : index
    %c0_117 = arith.constant 0 : index
    %179 = vector.load %arg12[%c2_115, %c0_116, %c0_117] : memref<4x4x1xf32, #tpu.memory_space<vmem>>, vector<1x4x1xf32>
    %180 = vector.shape_cast %179 : vector<1x4x1xf32> to vector<4x1xf32>
    %181 = arith.mulf %166, %178 : vector<4x1xf32>
    %182 = arith.subf %180, %181 : vector<4x1xf32>
    %183 = vector.broadcast %178 : vector<4x1xf32> to vector<4x128xf32>
    %184 = arith.mulf %159, %183 : vector<4x128xf32>
    %185 = vector.broadcast %182 : vector<4x1xf32> to vector<4x128xf32>
    %186 = arith.addf %184, %185 : vector<4x128xf32>
    %cst_118 = arith.constant 5.000000e-01 : f32
    %187 = vector.broadcast %cst_118 : f32 to vector<4x128xf32>
    %188 = arith.mulf %187, %186 : vector<4x128xf32>
    %cst_119 = arith.constant 0.707106769 : f32
    %189 = vector.broadcast %cst_119 : f32 to vector<4x128xf32>
    %190 = arith.mulf %186, %189 : vector<4x128xf32>
    %191 = math.erf %190 : vector<4x128xf32>
    %cst_120 = arith.constant 1.000000e+00 : f32
    %192 = vector.broadcast %cst_120 : f32 to vector<4x128xf32>
    %193 = arith.addf %192, %191 : vector<4x128xf32>
    %194 = arith.mulf %188, %193 : vector<4x128xf32>
    %195 = arith.truncf %194 : vector<4x128xf32> to vector<4x128xbf16>
    %c3 = arith.constant 3 : index
    %c0_121 = arith.constant 0 : index
    %c0_122 = arith.constant 0 : index
    %c0_123 = arith.constant 0 : index
    %196 = vector.load %arg10[%c3, %c0_121, %c0_122, %c0_123] : memref<4x3x4x4xbf16, #tpu.memory_space<vmem>>, vector<1x1x4x4xbf16>
    %197 = vector.shape_cast %196 : vector<1x1x4x4xbf16> to vector<4x4xbf16>
    %cst_124 = arith.constant dense<0.000000e+00> : vector<4x128xf32>
    %198 = tpu.matmul %197, %195, %cst_124 {dimension_numbers = #tpu.dot_dimension_numbers<[1], [0], [0], [1], [0, 0, 1, 1], [], []>} : vector<4x4xbf16>, vector<4x128xbf16>, vector<4x128xf32> -> vector<4x128xf32>
    %c3_125 = arith.constant 3 : index
    %c1_126 = arith.constant 1 : index
    %c0_127 = arith.constant 0 : index
    %c0_128 = arith.constant 0 : index
    %199 = vector.load %arg10[%c3_125, %c1_126, %c0_127, %c0_128] : memref<4x3x4x4xbf16, #tpu.memory_space<vmem>>, vector<1x1x4x4xbf16>
    %200 = vector.shape_cast %199 : vector<1x1x4x4xbf16> to vector<4x4xbf16>
    %cst_129 = arith.constant dense<0.000000e+00> : vector<4x128xf32>
    %201 = tpu.matmul %200, %195, %cst_129 {dimension_numbers = #tpu.dot_dimension_numbers<[1], [0], [0], [1], [0, 0, 1, 1], [], []>} : vector<4x4xbf16>, vector<4x128xbf16>, vector<4x128xf32> -> vector<4x128xf32>
    %c3_130 = arith.constant 3 : index
    %c2_131 = arith.constant 2 : index
    %c0_132 = arith.constant 0 : index
    %c0_133 = arith.constant 0 : index
    %202 = vector.load %arg10[%c3_130, %c2_131, %c0_132, %c0_133] : memref<4x3x4x4xbf16, #tpu.memory_space<vmem>>, vector<1x1x4x4xbf16>
    %203 = vector.shape_cast %202 : vector<1x1x4x4xbf16> to vector<4x4xbf16>
    %cst_134 = arith.constant dense<0.000000e+00> : vector<4x128xf32>
    %204 = tpu.matmul %203, %195, %cst_134 {dimension_numbers = #tpu.dot_dimension_numbers<[1], [0], [0], [1], [0, 0, 1, 1], [], []>} : vector<4x4xbf16>, vector<4x128xbf16>, vector<4x128xf32> -> vector<4x128xf32>
    %c1_i32_135 = arith.constant 1 : i32
    %205 = tpu.dynamic_rotate %198 by %c1_i32_135 dim 1 : vector<4x128xf32>, i32 -> vector<4x128xf32>
    %206 = vector.broadcast %1 : vector<1x128xf32> to vector<4x128xf32>
    %207 = arith.mulf %205, %206 : vector<4x128xf32>
    %208 = arith.addf %207, %201 : vector<4x128xf32>
    %c127_i32_136 = arith.constant 127 : i32
    %209 = tpu.dynamic_rotate %204 by %c127_i32_136 dim 1 : vector<4x128xf32>, i32 -> vector<4x128xf32>
    %210 = vector.broadcast %2 : vector<1x128xf32> to vector<4x128xf32>
    %211 = arith.mulf %209, %210 : vector<4x128xf32>
    %212 = arith.addf %208, %211 : vector<4x128xf32>
    %213 = vector.broadcast %3 : vector<1x128xf32> to vector<4x128xf32>
    %214 = arith.mulf %212, %213 : vector<4x128xf32>
    %cst_137 = arith.constant dense<0.000000e+00> : vector<4xf32>
    %215 = vector.multi_reduction <add>, %214, %cst_137 [1] : vector<4x128xf32> to vector<4xf32>
    %216 = vector.shape_cast %215 : vector<4xf32> to vector<4x1xf32>
    %217 = arith.mulf %214, %214 : vector<4x128xf32>
    %cst_138 = arith.constant dense<0.000000e+00> : vector<4xf32>
    %218 = vector.multi_reduction <add>, %217, %cst_138 [1] : vector<4x128xf32> to vector<4xf32>
    %219 = vector.shape_cast %218 : vector<4xf32> to vector<4x1xf32>
    %cst_139 = arith.constant 3.125000e-02 : f32
    %220 = vector.broadcast %cst_139 : f32 to vector<4x1xf32>
    %221 = arith.mulf %216, %220 : vector<4x1xf32>
    %cst_140 = arith.constant 3.125000e-02 : f32
    %222 = vector.broadcast %cst_140 : f32 to vector<4x1xf32>
    %223 = arith.mulf %219, %222 : vector<4x1xf32>
    %224 = arith.mulf %221, %221 : vector<4x1xf32>
    %225 = arith.subf %223, %224 : vector<4x1xf32>
    %cst_141 = arith.constant 0.000000e+00 : f32
    %226 = vector.broadcast %cst_141 : f32 to vector<4x1xf32>
    %227 = arith.maximumf %225, %226 : vector<4x1xf32>
    %c3_142 = arith.constant 3 : index
    %c0_143 = arith.constant 0 : index
    %c0_144 = arith.constant 0 : index
    %228 = vector.load %arg11[%c3_142, %c0_143, %c0_144] : memref<4x4x1xf32, #tpu.memory_space<vmem>>, vector<1x4x1xf32>
    %229 = vector.shape_cast %228 : vector<1x4x1xf32> to vector<4x1xf32>
    %cst_145 = arith.constant 9.99999974E-6 : f32
    %230 = vector.broadcast %cst_145 : f32 to vector<4x1xf32>
    %231 = arith.addf %227, %230 : vector<4x1xf32>
    %232 = math.rsqrt %231 : vector<4x1xf32>
    %233 = arith.mulf %229, %232 : vector<4x1xf32>
    %c3_146 = arith.constant 3 : index
    %c0_147 = arith.constant 0 : index
    %c0_148 = arith.constant 0 : index
    %234 = vector.load %arg12[%c3_146, %c0_147, %c0_148] : memref<4x4x1xf32, #tpu.memory_space<vmem>>, vector<1x4x1xf32>
    %235 = vector.shape_cast %234 : vector<1x4x1xf32> to vector<4x1xf32>
    %236 = arith.mulf %221, %233 : vector<4x1xf32>
    %237 = arith.subf %235, %236 : vector<4x1xf32>
    %238 = vector.broadcast %233 : vector<4x1xf32> to vector<4x128xf32>
    %239 = arith.mulf %214, %238 : vector<4x128xf32>
    %240 = vector.broadcast %237 : vector<4x1xf32> to vector<4x128xf32>
    %241 = arith.addf %239, %240 : vector<4x128xf32>
    %cst_149 = arith.constant 5.000000e-01 : f32
    %242 = vector.broadcast %cst_149 : f32 to vector<4x128xf32>
    %243 = arith.mulf %242, %241 : vector<4x128xf32>
    %cst_150 = arith.constant 0.707106769 : f32
    %244 = vector.broadcast %cst_150 : f32 to vector<4x128xf32>
    %245 = arith.mulf %241, %244 : vector<4x128xf32>
    %246 = math.erf %245 : vector<4x128xf32>
    %cst_151 = arith.constant 1.000000e+00 : f32
    %247 = vector.broadcast %cst_151 : f32 to vector<4x128xf32>
    %248 = arith.addf %247, %246 : vector<4x128xf32>
    %249 = arith.mulf %243, %248 : vector<4x128xf32>
    %c0_152 = arith.constant 0 : index
    %c0_153 = arith.constant 0 : index
    %250 = vector.load %arg13[%c0_152, %c0_153] : memref<4x128xf32, #tpu.memory_space<vmem>>, vector<4x128xf32>
    tpu.vector_store %arg13[%c0_152, %c0_153], %249 {strides = array<i32>} : memref<4x128xf32, #tpu.memory_space<vmem>>, vector<4x128xf32>,
    return
  }
  func.func @transform_0(%arg0: i32) -> (i32, i32) {
    %c0_i32 = arith.constant 0 : i32
    %c0_i32_0 = arith.constant 0 : i32
    %c0_i32_1 = arith.constant 0 : i32
    return %c0_i32, %c0_i32_0 : i32, i32
  }
  func.func @transform_1(%arg0: i32) -> (i32, i32) {
    %c0_i32 = arith.constant 0 : i32
    %c0_i32_0 = arith.constant 0 : i32
    %c0_i32_1 = arith.constant 0 : i32
    return %c0_i32, %c0_i32_0 : i32, i32
  }
  func.func @transform_2(%arg0: i32) -> (i32, i32) {
    %c0_i32 = arith.constant 0 : i32
    %c0_i32_0 = arith.constant 0 : i32
    %c0_i32_1 = arith.constant 0 : i32
    return %c0_i32, %c0_i32_0 : i32, i32
  }
  func.func @transform_3(%arg0: i32) -> (i32, i32) {
    %c0_i32 = arith.constant 0 : i32
    %c0_i32_0 = arith.constant 0 : i32
    %c0_i32_1 = arith.constant 0 : i32
    return %c0_i32, %c0_i32_0 : i32, i32
  }
  func.func @transform_4(%arg0: i32) -> (i32, i32) {
    %c0_i32 = arith.constant 0 : i32
    %c0_i32_0 = arith.constant 0 : i32
    %c0_i32_1 = arith.constant 0 : i32
    return %c0_i32, %c0_i32_0 : i32, i32
  }
  func.func @transform_5(%arg0: i32) -> (i32, i32) {
    %c0_i32 = arith.constant 0 : i32
    %c0_i32_0 = arith.constant 0 : i32
    %c0_i32_1 = arith.constant 0 : i32
    return %c0_i32, %c0_i32_0 : i32, i32
  }
  func.func @transform_6(%arg0: i32) -> (i32, i32, i32) {
    %c0_i32 = arith.constant 0 : i32
    %c0_i32_0 = arith.constant 0 : i32
    %c0_i32_1 = arith.constant 0 : i32
    %c0_i32_2 = arith.constant 0 : i32
    return %c0_i32, %c0_i32_0, %c0_i32_1 : i32, i32, i32
  }
  func.func @transform_7(%arg0: i32) -> (i32, i32, i32) {
    %c0_i32 = arith.constant 0 : i32
    %c0_i32_0 = arith.constant 0 : i32
    %c0_i32_1 = arith.constant 0 : i32
    %c0_i32_2 = arith.constant 0 : i32
    return %c0_i32, %c0_i32_0, %c0_i32_1 : i32, i32, i32
  }
  func.func @transform_8(%arg0: i32) -> (i32, i32) {
    %c0_i32 = arith.constant 0 : i32
    %c0_i32_0 = arith.constant 0 : i32
    %c0_i32_1 = arith.constant 0 : i32
    return %c0_i32, %c0_i32_0 : i32, i32
  }
  func.func @transform_9(%arg0: i32) -> (i32, i32, i32, i32) {
    %c0_i32 = arith.constant 0 : i32
    %c0_i32_0 = arith.constant 0 : i32
    %c0_i32_1 = arith.constant 0 : i32
    %c0_i32_2 = arith.constant 0 : i32
    %c0_i32_3 = arith.constant 0 : i32
    return %c0_i32, %c0_i32_0, %c0_i32_1, %c0_i32_2 : i32, i32, i32, i32
  }
  func.func @transform_10(%arg0: i32) -> (i32, i32, i32) {
    %c0_i32 = arith.constant 0 : i32
    %c0_i32_0 = arith.constant 0 : i32
    %c0_i32_1 = arith.constant 0 : i32
    %c0_i32_2 = arith.constant 0 : i32
    return %c0_i32, %c0_i32_0, %c0_i32_1 : i32, i32, i32
  }
  func.func @transform_11(%arg0: i32) -> (i32, i32, i32) {
    %c0_i32 = arith.constant 0 : i32
    %c0_i32_0 = arith.constant 0 : i32
    %c0_i32_1 = arith.constant 0 : i32
    %c0_i32_2 = arith.constant 0 : i32
    return %c0_i32, %c0_i32_0, %c0_i32_1 : i32, i32, i32
  }
  func.func @transform_12(%arg0: i32) -> (i32, i32) {
    %c0_i32 = arith.constant 0 : i32
    %c0_i32_0 = arith.constant 0 : i32
    %c0_i32_1 = arith.constant 0 : i32
    return %c0_i32, %c0_i32_0 : i32, i32
  }
}

</mosaic_0001>

<bundles_post_ra>
// kernel: tpu_custom_call.1
= control target key start
LH: loop header
LB: loop body
LE: loop exit
PB: predicated region body
PF: predicated region fallthrough
CT: control target
= control target key end

     0   :  { %vm56_vm0 = vcmask 1041408   ;;  %v1245_v2 = vmov 0.0   ;;  %vm52_vm1 = vcmask 31744   ;;  %vm1246_vm2 = vmmov 0   ;;  %s1516_s0 = inlined_call_operand.vmem [shape: bf16[4,128], index: 0, kind: input, shape index: {}]   ;;  %s1517_s1 = inlined_call_operand.vmem [shape: bf16[4,128], index: 1, kind: input, shape index: {}]   ;;  %s1518_s2 = inlined_call_operand.vmem [shape: f32[1,128], index: 2, kind: input, shape index: {}]   ;;  %s1519_s3 = inlined_call_operand.vmem [shape: f32[1,128], index: 3, kind: input, shape index: {}]   ;;  %s1520_s4 = inlined_call_operand.vmem [shape: f32[1,128], index: 4, kind: input, shape index: {}]   ;;  %s1521_s5 = inlined_call_operand.vmem [shape: f32[1,128], index: 5, kind: input, shape index: {}]   ;;  %s1522_s6 = inlined_call_operand.vmem [shape: bf16[2,4,4], index: 6, kind: input, shape index: {}]   ;;  %s1523_s7 = inlined_call_operand.vmem [shape: bf16[2,4,4], index: 7, kind: input, shape index: {}]   ;;  %s1524_s8 = inlined_call_operand.vmem [shape: f32[4,1], index: 8, kind: input, shape index: {}]   ;;  %s1525_s9 = inlined_call_operand.vmem [shape: bf16[4,3,4,4], index: 9, kind: input, shape index: {}]   ;;  %s1526_s10 = inlined_call_operand.vmem [shape: f32[4,4,1], index: 10, kind: input, shape index: {}]   ;;  %s1527_s11 = inlined_call_operand.vmem [shape: f32[4,4,1], index: 11, kind: input, shape index: {}]   ;;  %s1528_s12 = inlined_call_operand.hbm [shape: f32[4,128], index: 12, kind: output, shape index: {}]  }
   0x1   :  { %v48_v0 = vld [vmem:[%s1517_s1] sm:$0x3]  ;;  %1103 = vmatprep.subr.bf16.mxu0 %v1245_v2  ;;  %1109 = vmatprep.subr.bf16.mxu1 %v1245_v2 }
   0x2   :  { %v47_v1 = vld [vmem:[%s1516_s0] sm:$0x3]  ;;  %v58_v3 = vsel %vm56_vm0, %v48_v0, 0  ;;  %1105 = vmatprep.mubr.msk.bf16.mxu0 %vm1246_vm2, %v1245_v2  ;;  %1111 = vmatprep.mubr.msk.bf16.mxu1 %vm1246_vm2, %v1245_v2 }
   0x3   :  { %v104_v4 = vsel %vm56_vm0, %v47_v1, 0  ;;  %1104 = vmatpush3.bf16.msra.mxu0 %v58_v3  ;;  %v51_v5 = vld [vmem:[%s1523_s7] sm:$0x3] }
   0x4   :  { %1110 = vmatpush3.bf16.msra.mxu1 %v104_v4  ;;  %v50_v6 = vld [vmem:[%s1522_s6] sm:$0x3] }
   0x5   :  { %17 = vsyncpa [#allocation3], 0  ;;  %1115 = vmatprep.subr.bf16.mxu0 %v1245_v2  ;;  %1121 = vmatprep.subr.bf16.mxu1 %v1245_v2  ;;  %v49_v7 = vld [vmem:[%s1524_s8] sm:$0xf]  ;;  %v1247_v8 = vmov 0   ;;  %v237_v11 = vlaneseq  ;;  %s1248_s19 = smov 1  }
   0x6   :  { %1106 = vmatmul.mubr.msk.bf16.vlgmr.msra.gmra.mxu0 %vm52_vm1, %v51_v5  ;;  %1205 = vset.pattern.permute.xlu0 %v1247_v8  ;;  %v1036_v9 = vld [vmem:[%s1523_s7 + $0x2] sm:$0x3]  ;;  %v43_v15 = vld [vmem:[%s1518_s2] sm:$0x1]  ;;  %v1042_v45 = vld [vmem:[%s1525_s9 + $0x4] sm:$0x3] }
   0x7   :  { %1112 = vmatmul.mubr.msk.bf16.vlgmr.msra.gmra.mxu1 %vm52_vm1, %v50_v6  ;;  %1116 = vmatpush3.bf16.msra.mxu0 %v58_v3  ;;  %v1035_v10 = vld [vmem:[%s1522_s6 + $0x2] sm:$0x3]  ;;  %v238_v12 = vshrl.u32 %v237_v11, 7  ;;  %v243_v19 = vsub.f32 1.0, %v43_v15  ;;  %v259_v43 = vld [vmem:[%s1525_s9] sm:$0x3] }
   0x8   :  { %1122 = vmatpush3.bf16.msra.mxu1 %v104_v4  ;;  %1117 = vmatprep.mubr.msk.bf16.mxu0 %vm1246_vm2, %v1245_v2  ;;  %v1040_v44 = vld [vmem:[%s1525_s9 + $0x2] sm:$0x3]  ;;  %s1249_s20 = smov 127   ;;  %v1391_v58 = vld [vmem:[%s1519_s3] ss:$0 sm:$0xff]  ;;  %vm423_vm3 = vcmask 1043456  }
   0x9   :  { %1123 = vmatprep.mubr.msk.bf16.mxu1 %vm1246_vm2, %v1245_v2  ;;  %1127 = vmatprep.subr.bf16.mxu0 %v1245_v2  ;;  %v239_v18 = vsub.s32 0, %v238_v12  ;;  %v1397_v61 = vld [vmem:[%s1520_s4] ss:$0 sm:$0xff]  ;;  %s1250_s28 = smov [#allocation2]  }
   0xa   :  { %254 = vperm.xlu0 %1205, %v49_v7   ;;  %1133 = vmatprep.subr.bf16.mxu1 %v1245_v2  ;;  %v1403_v1 = vld [vmem:[%s1521_s5] ss:$0 sm:$0xff]  ;;  %s1025_s29 = sshll.u32 %s1250_s28, 4  ;;  %s1026_s29 = int_to_ptr.vmem [resolvable:$true] %s1025_s29 }
   0xb   :  { %1206 = vset.pattern.permute.xlu1 %v1247_v8  ;;  %v240_v25 = vrot.slane %v43_v15, %v239_v18  ;;  %v248_v26 = vrot.slane %v243_v19, %v239_v18  ;;  %v440_v19 = vld [vmem:[%s1527_s11] sm:$0xf]  ;;  %p1228_p1 = scmp.lt.s32.totalorder %s1026_s29, %s1026_s29 }
   0xe   :  { %1118 = vmatmul.mubr.msk.bf16.vlgmr.msra.gmra.mxu0 %vm52_vm1, %v1036_v9 }
   0xf   :  { %1124 = vmatmul.mubr.msk.bf16.vlgmr.msra.gmra.mxu1 %vm52_vm1, %v1035_v10  ;;  %1129 = vmatprep.mubr.msk.bf16.mxu0 %vm1246_vm2, %v1245_v2 }
  0x10   :  { %1135 = vmatprep.mubr.msk.bf16.mxu1 %vm1246_vm2, %v1245_v2 }
  0x85   :  { %v255_v34 = vpop.permute.xlu0 %254 }
  0xc6   :  { %v94_v13 = vpop.f32.mrf.mxu0 }
  0xc7   :  { %v140_v14 = vpop.f32.mrf.mxu1 }
  0xc8   :  { %v1107_v16 = vpop.f32.mrf.mxu0  ;;  %v141_v24 = vadd.f32 %v140_v14, %v94_v13 }
  0xc9   :  { %v1113_v17 = vpop.f32.mrf.mxu1  ;;  %v436_v16 = vld [vmem:[%s1526_s10] sm:$0xf] }
  0xca   :  { %v97_v20 = vpop.f32.mrf.mxu0  ;;  %v242_v32 = vmul.f32 %v240_v25, %v141_v24 }
  0xcb   :  { %v143_v21 = vpop.f32.mrf.mxu1 }
  0xcc   :  { %v1108_v22 = vpop.f32.mrf.mxu0 }
  0xcd   :  { %v1114_v23 = vpop.f32.mrf.mxu1 }
  0xce   :  { %v187_v27 = vpop.f32.mrf.mxu0 }
  0xcf   :  { %v230_v28 = vpop.f32.mrf.mxu1 }
  0xd0   :  { %v231_v29 = vadd.f32 %v230_v28, %v187_v27  ;;  %v1119_v30 = vpop.f32.mrf.mxu0 }
  0xd1   :  { %v1125_v31 = vpop.f32.mrf.mxu1 }
  0xd2   :  { %v250_v33 = vmul.f32 %v248_v26, %v231_v29  ;;  %v190_v35 = vpop.f32.mrf.mxu0 }
  0xd3   :  { %v233_v36 = vpop.f32.mrf.mxu1  ;;  %v1051_v35 = vld [vmem:[%s1525_s9 + $0xa] sm:$0x3] }
  0xd4   :  { %v251_v37 = vadd.f32 %v250_v33, %v242_v32  ;;  %v1120_v38 = vpop.f32.mrf.mxu0  ;;  %v1047_v33 = vld [vmem:[%s1525_s9 + $0x6] sm:$0x3] }
  0xd5   :  { %v1126_v39 = vpop.f32.mrf.mxu1 }
  0xd6   :  { %v257_v40 = vadd.f32 %v255_v34, %v251_v37  ;;  %v1049_v34 = vld [vmem:[%s1525_s9 + $0x8] sm:$0x3] }
  0xd8   :  { %v258_v41 = vpack.c.bf16 %v257_v40, %v257_v40 }
  0xda   :  { %v264_v42 = vsel %vm56_vm0, %v258_v41, 0 }
  0xdb   :  { %1128 = vmatpush3.bf16.msra.mxu0 %v264_v42  ;;  %1134 = vmatpush3.bf16.msra.mxu1 %v264_v42 }
  0xdc   :  { %1139 = vmatprep.subr.bf16.mxu0 %v1245_v2  ;;  %1145 = vmatprep.subr.bf16.mxu1 %v1245_v2 }
  0xde   :  { %1130 = vmatmul.mubr.msk.bf16.vlgmr.msra.gmra.mxu0 %vm52_vm1, %v259_v43  ;;  %1136 = vmatmul.mubr.msk.bf16.vlgmr.msra.gmra.mxu1 %vm52_vm1, %v1040_v44 }
  0xdf   :  { %1140 = vmatpush3.bf16.msra.mxu0 %v264_v42  ;;  %1141 = vmatprep.mubr.msk.bf16.mxu0 %vm1246_vm2, %v1245_v2 }
  0xe0   :  { %1151 = vmatprep.subr.bf16.mxu0 %v1245_v2  ;;  %1147 = vmatprep.mubr.msk.bf16.mxu1 %vm1246_vm2, %v1245_v2 }
  0xe6   :  { %1142 = vmatmul.mubr.msk.bf16.vlgmr.msra.gmra.mxu0 %vm52_vm1, %v1042_v45 }
  0xe7   :  { %1153 = vmatprep.mubr.msk.bf16.mxu0 %vm1246_vm2, %v1245_v2 }
 0x19e   :  { %v300_v46 = vpop.f32.mrf.mxu0  ;;  %v345_v47 = vpop.f32.mrf.mxu1 }
 0x19f   :  { %396 = vrot.lane.b32.xlu0 %v300_v46, %s1248_s19 }
 0x1a0   :  { %v1131_v48 = vpop.f32.mrf.mxu0  ;;  %v1137_v49 = vpop.f32.mrf.mxu1 }
 0x1a2   :  { %v303_v50 = vpop.f32.mrf.mxu0  ;;  %v348_v51 = vpop.f32.mrf.mxu1 }
 0x1a4   :  { %v1132_v52 = vpop.f32.mrf.mxu0  ;;  %v1138_v53 = vpop.f32.mrf.mxu1 }
 0x1a6   :  { %v390_v54 = vpop.f32.mrf.mxu0 }
 0x1a7   :  { %406 = vrot.lane.b32.xlu1 %v390_v54, %s1249_s20 }
 0x1a8   :  { %v1143_v55 = vpop.f32.mrf.mxu0 }
 0x1aa   :  { %v393_v56 = vpop.f32.mrf.mxu0 }
 0x1ac   :  { %v1144_v57 = vpop.f32.mrf.mxu0 }
 0x211   :  { %v397_v59 = vpop.permute.xlu0 %396 }
 0x212   :  { %v404_v60 = vmul.f32 %v1391_v58, %v397_v59 }
 0x214   :  { %v405_v63 = vadd.f32 %v404_v60, %v345_v47 }
 0x219   :  { %v407_v62 = vpop.permute.xlu1 %406 }
 0x21a   :  { %v414_v0 = vmul.f32 %v1397_v61, %v407_v62 }
 0x21c   :  { %v415_v3 = vadd.f32 %v414_v0, %v405_v63 }
 0x21e   :  { %v422_v4 = vmul.f32 %v1403_v1, %v415_v3 }
 0x220   :  { %v424_v5 = vsel %vm423_vm3, %v422_v4, 0.0  ;;  %v427_v6 = vmul.f32 %v422_v4, %v422_v4 }
 0x221   :  { %425 = vadd.xlane.f32.xlu1 %v424_v5 }
 0x222   :  { %v428_v7 = vsel %vm423_vm3, %v427_v6, 0.0  ;;  %v1053_v6 = vld [vmem:[%s1526_s10 + $0x4] sm:$0xf] }
 0x223   :  { %429 = vadd.xlane.f32.xlu0 %v428_v7 }
 0x2aa   :  { %v426_v8 = vpop.xlane.xlu1 %425 }
 0x2ab   :  { %v431_v9 = vmul.f32 0.03125, %v426_v8 }
 0x2ac   :  { %v430_v10 = vpop.xlane.xlu0 %429 }
 0x2ad   :  { %v433_v11 = vmul.f32 %v431_v9, %v431_v9  ;;  %v432_v12 = vmul.f32 0.03125, %v430_v10 }
 0x2af   :  { %v434_v13 = vsub.f32 %v432_v12, %v433_v11 }
 0x2b1   :  { %v435_v14 = vmax.f32 %v434_v13, 0.0 }
 0x2b3   :  { %v437_v15 = vadd.f32 1e-05, %v435_v14 }
 0x2b5   :  { %1207 = vrsqrt.f32 %v437_v15 }
 0x2c2   :  { %v1208_v17 = vpop.eup %1207 }
 0x2c3   :  { %v439_v18 = vmul.f32 %v1208_v17, %v436_v16 }
 0x2c5   :  { %445 = vperm.xlu0 %1205, %v439_v18   ;;  %v441_v20 = vmul.f32 %v439_v18, %v431_v9  ;;  %v1054_v9 = vld [vmem:[%s1527_s11 + $0x4] sm:$0xf] }
 0x2c7   :  { %v442_v21 = vsub.f32 %v440_v19, %v441_v20 }
 0x2c9   :  { %451 = vperm.xlu1 %1206, %v442_v21  }
 0x340   :  { %v446_v22 = vpop.permute.xlu0 %445 }
 0x341   :  { %v448_v23 = vmul.f32 %v446_v22, %v422_v4 }
 0x344   :  { %v452_v24 = vpop.permute.xlu1 %451 }
 0x345   :  { %v454_v25 = vadd.f32 %v452_v24, %v448_v23  ;;  %v1055_v23 = vld [vmem:[%s1525_s9 + $0xc] sm:$0x3]  ;;  %v1057_v24 = vld [vmem:[%s1525_s9 + $0xe] sm:$0x3] }
 0x347   :  { %v456_v26 = vmul.f32 0.70710677, %v454_v25  ;;  %v455_v28 = vmul.f32 0.5, %v454_v25  ;;  %v1059_v25 = vld [vmem:[%s1525_s9 + $0x10] sm:$0x3] }
 0x349   :  { %1209 = verf.f32 %v456_v26 }
 0x356   :  { %v1210_v27 = vpop.eup %1209 }
 0x357   :  { %v458_v29 = vadd.f32 1.0, %v1210_v27 }
 0x359   :  { %v459_v30 = vmul.f32 %v458_v29, %v455_v28 }
 0x35b   :  { %v460_v31 = vpack.c.bf16 %v459_v30, %v459_v30 }
 0x35d   :  { %v467_v32 = vsel %vm56_vm0, %v460_v31, 0 }
 0x35e   :  { %1146 = vmatpush3.bf16.msra.mxu1 %v467_v32  ;;  %1152 = vmatpush3.bf16.msra.mxu0 %v467_v32 }
 0x35f   :  { %1157 = vmatprep.subr.bf16.mxu1 %v1245_v2  ;;  %1163 = vmatprep.subr.bf16.mxu0 %v1245_v2 }
 0x361   :  { %1148 = vmatmul.mubr.msk.bf16.vlgmr.msra.gmra.mxu1 %vm52_vm1, %v1047_v33  ;;  %1154 = vmatmul.mubr.msk.bf16.vlgmr.msra.gmra.mxu0 %vm52_vm1, %v1049_v34 }
 0x362   :  { %1158 = vmatpush3.bf16.msra.mxu1 %v467_v32  ;;  %1159 = vmatprep.mubr.msk.bf16.mxu1 %vm1246_vm2, %v1245_v2 }
 0x363   :  { %1169 = vmatprep.subr.bf16.mxu1 %v1245_v2  ;;  %1165 = vmatprep.mubr.msk.bf16.mxu0 %vm1246_vm2, %v1245_v2 }
 0x369   :  { %1160 = vmatmul.mubr.msk.bf16.vlgmr.msra.gmra.mxu1 %vm52_vm1, %v1051_v35 }
 0x36a   :  { %1171 = vmatprep.mubr.msk.bf16.mxu1 %vm1246_vm2, %v1245_v2 }
 0x421   :  { %v503_v36 = vpop.f32.mrf.mxu1  ;;  %v548_v37 = vpop.f32.mrf.mxu0 }
 0x422   :  { %599 = vrot.lane.b32.xlu1 %v503_v36, %s1248_s19 }
 0x423   :  { %v1149_v38 = vpop.f32.mrf.mxu1  ;;  %v1155_v39 = vpop.f32.mrf.mxu0 }
 0x425   :  { %v506_v40 = vpop.f32.mrf.mxu1  ;;  %v551_v41 = vpop.f32.mrf.mxu0 }
 0x427   :  { %v1150_v42 = vpop.f32.mrf.mxu1  ;;  %v1156_v43 = vpop.f32.mrf.mxu0 }
 0x429   :  { %v593_v44 = vpop.f32.mrf.mxu1 }
 0x42a   :  { %603 = vrot.lane.b32.xlu0 %v593_v44, %s1249_s20 }
 0x42b   :  { %v1161_v45 = vpop.f32.mrf.mxu1 }
 0x42d   :  { %v596_v46 = vpop.f32.mrf.mxu1 }
 0x42f   :  { %v1162_v47 = vpop.f32.mrf.mxu1 }
 0x494   :  { %v600_v48 = vpop.permute.xlu1 %599 }
 0x495   :  { %v601_v49 = vmul.f32 %v1391_v58, %v600_v48 }
 0x497   :  { %v602_v51 = vadd.f32 %v601_v49, %v548_v37 }
 0x49c   :  { %v604_v50 = vpop.permute.xlu0 %603 }
 0x49d   :  { %v605_v52 = vmul.f32 %v1397_v61, %v604_v50 }
 0x49f   :  { %v606_v53 = vadd.f32 %v605_v52, %v602_v51 }
 0x4a1   :  { %v607_v54 = vmul.f32 %v1403_v1, %v606_v53 }
 0x4a3   :  { %v608_v55 = vsel %vm423_vm3, %v607_v54, 0.0  ;;  %v611_v56 = vmul.f32 %v607_v54, %v607_v54 }
 0x4a4   :  { %609 = vadd.xlane.f32.xlu1 %v608_v55 }
 0x4a5   :  { %v612_v57 = vsel %vm423_vm3, %v611_v56, 0.0  ;;  %v1061_v56 = vld [vmem:[%s1526_s10 + $0x8] sm:$0xf] }
 0x4a6   :  { %613 = vadd.xlane.f32.xlu0 %v612_v57 }
 0x52d   :  { %v610_v59 = vpop.xlane.xlu1 %609 }
 0x52e   :  { %v615_v60 = vmul.f32 0.03125, %v610_v59 }
 0x52f   :  { %v614_v62 = vpop.xlane.xlu0 %613 }
 0x530   :  { %v617_v63 = vmul.f32 %v615_v60, %v615_v60  ;;  %v616_v0 = vmul.f32 0.03125, %v614_v62 }
 0x532   :  { %v618_v3 = vsub.f32 %v616_v0, %v617_v63 }
 0x534   :  { %v619_v4 = vmax.f32 %v618_v3, 0.0 }
 0x536   :  { %v622_v5 = vadd.f32 1e-05, %v619_v4 }
 0x538   :  { %1211 = vrsqrt.f32 %v622_v5 }
 0x545   :  { %v1212_v7 = vpop.eup %1211 }
 0x546   :  { %v624_v8 = vmul.f32 %v1212_v7, %v1053_v6 }
 0x548   :  { %631 = vperm.xlu0 %1205, %v624_v8   ;;  %v627_v10 = vmul.f32 %v624_v8, %v615_v60  ;;  %v1062_v60 = vld [vmem:[%s1527_s11 + $0x8] sm:$0xf] }
 0x54a   :  { %v628_v11 = vsub.f32 %v1054_v9, %v627_v10 }
 0x54c   :  { %637 = vperm.xlu1 %1206, %v628_v11  }
 0x5c3   :  { %v632_v12 = vpop.permute.xlu0 %631 }
 0x5c4   :  { %v634_v13 = vmul.f32 %v632_v12, %v607_v54 }
 0x5c7   :  { %v638_v14 = vpop.permute.xlu1 %637 }
 0x5c8   :  { %v640_v15 = vadd.f32 %v638_v14, %v634_v13  ;;  %v1063_v13 = vld [vmem:[%s1525_s9 + $0x12] sm:$0x3]  ;;  %v1065_v14 = vld [vmem:[%s1525_s9 + $0x14] sm:$0x3] }
 0x5ca   :  { %v642_v16 = vmul.f32 0.70710677, %v640_v15  ;;  %v641_v18 = vmul.f32 0.5, %v640_v15  ;;  %v1067_v15 = vld [vmem:[%s1525_s9 + $0x16] sm:$0x3] }
 0x5cc   :  { %1213 = verf.f32 %v642_v16 }
 0x5d9   :  { %v1214_v17 = vpop.eup %1213 }
 0x5da   :  { %v644_v19 = vadd.f32 1.0, %v1214_v17 }
 0x5dc   :  { %v645_v20 = vmul.f32 %v644_v19, %v641_v18 }
 0x5de   :  { %v646_v21 = vpack.c.bf16 %v645_v20, %v645_v20 }
 0x5e0   :  { %v653_v22 = vsel %vm56_vm0, %v646_v21, 0 }
 0x5e1   :  { %1164 = vmatpush3.bf16.msra.mxu0 %v653_v22  ;;  %1170 = vmatpush3.bf16.msra.mxu1 %v653_v22 }
 0x5e2   :  { %1175 = vmatprep.subr.bf16.mxu0 %v1245_v2  ;;  %1181 = vmatprep.subr.bf16.mxu1 %v1245_v2 }
 0x5e4   :  { %1166 = vmatmul.mubr.msk.bf16.vlgmr.msra.gmra.mxu0 %vm52_vm1, %v1055_v23  ;;  %1172 = vmatmul.mubr.msk.bf16.vlgmr.msra.gmra.mxu1 %vm52_vm1, %v1057_v24 }
 0x5e5   :  { %1176 = vmatpush3.bf16.msra.mxu0 %v653_v22  ;;  %1177 = vmatprep.mubr.msk.bf16.mxu0 %vm1246_vm2, %v1245_v2 }
 0x5e6   :  { %1187 = vmatprep.subr.bf16.mxu0 %v1245_v2  ;;  %1183 = vmatprep.mubr.msk.bf16.mxu1 %vm1246_vm2, %v1245_v2 }
 0x5ec   :  { %1178 = vmatmul.mubr.msk.bf16.vlgmr.msra.gmra.mxu0 %vm52_vm1, %v1059_v25 }
 0x5ed   :  { %1189 = vmatprep.mubr.msk.bf16.mxu0 %vm1246_vm2, %v1245_v2 }
 0x6a4   :  { %v689_v26 = vpop.f32.mrf.mxu0  ;;  %v734_v27 = vpop.f32.mrf.mxu1 }
 0x6a5   :  { %785 = vrot.lane.b32.xlu1 %v689_v26, %s1248_s19 }
 0x6a6   :  { %v1167_v28 = vpop.f32.mrf.mxu0  ;;  %v1173_v29 = vpop.f32.mrf.mxu1 }
 0x6a8   :  { %v692_v30 = vpop.f32.mrf.mxu0  ;;  %v737_v31 = vpop.f32.mrf.mxu1 }
 0x6aa   :  { %v1168_v32 = vpop.f32.mrf.mxu0  ;;  %v1174_v33 = vpop.f32.mrf.mxu1 }
 0x6ac   :  { %v779_v34 = vpop.f32.mrf.mxu0 }
 0x6ad   :  { %789 = vrot.lane.b32.xlu0 %v779_v34, %s1249_s20 }
 0x6ae   :  { %v1179_v35 = vpop.f32.mrf.mxu0 }
 0x6b0   :  { %v782_v36 = vpop.f32.mrf.mxu0 }
 0x6b2   :  { %v1180_v37 = vpop.f32.mrf.mxu0 }
 0x717   :  { %v786_v38 = vpop.permute.xlu1 %785 }
 0x718   :  { %v787_v39 = vmul.f32 %v1391_v58, %v786_v38 }
 0x71a   :  { %v788_v41 = vadd.f32 %v787_v39, %v734_v27 }
 0x71f   :  { %v790_v40 = vpop.permute.xlu0 %789 }
 0x720   :  { %v791_v42 = vmul.f32 %v1397_v61, %v790_v40 }
 0x722   :  { %v792_v43 = vadd.f32 %v791_v42, %v788_v41 }
 0x724   :  { %v793_v44 = vmul.f32 %v1403_v1, %v792_v43 }
 0x726   :  { %v794_v45 = vsel %vm423_vm3, %v793_v44, 0.0  ;;  %v797_v46 = vmul.f32 %v793_v44, %v793_v44 }
 0x727   :  { %795 = vadd.xlane.f32.xlu1 %v794_v45  ;;  %v1070_v45 = vld [vmem:[%s1527_s11 + $0xc] sm:$0xf] }
 0x728   :  { %v798_v47 = vsel %vm423_vm3, %v797_v46, 0.0 }
 0x729   :  { %799 = vadd.xlane.f32.xlu0 %v798_v47 }
 0x7b0   :  { %v796_v48 = vpop.xlane.xlu1 %795 }
 0x7b1   :  { %v801_v49 = vmul.f32 0.03125, %v796_v48 }
 0x7b2   :  { %v800_v50 = vpop.xlane.xlu0 %799 }
 0x7b3   :  { %v803_v51 = vmul.f32 %v801_v49, %v801_v49  ;;  %v802_v52 = vmul.f32 0.03125, %v800_v50 }
 0x7b5   :  { %v804_v53 = vsub.f32 %v802_v52, %v803_v51 }
 0x7b7   :  { %v805_v54 = vmax.f32 %v804_v53, 0.0 }
 0x7b9   :  { %v808_v55 = vadd.f32 1e-05, %v805_v54 }
 0x7bb   :  { %1215 = vrsqrt.f32 %v808_v55 }
 0x7c8   :  { %v1216_v57 = vpop.eup %1215 }
 0x7c9   :  { %v810_v59 = vmul.f32 %v1216_v57, %v1061_v56 }
 0x7cb   :  { %817 = vperm.xlu0 %1205, %v810_v59   ;;  %v813_v62 = vmul.f32 %v810_v59, %v801_v49 }
 0x7cd   :  { %v814_v63 = vsub.f32 %v1062_v60, %v813_v62 }
 0x7cf   :  { %823 = vperm.xlu1 %1206, %v814_v63  }
 0x846   :  { %v818_v0 = vpop.permute.xlu0 %817 }
 0x847   :  { %v820_v3 = vmul.f32 %v818_v0, %v793_v44 }
 0x84a   :  { %v824_v4 = vpop.permute.xlu1 %823 }
 0x84b   :  { %v826_v5 = vadd.f32 %v824_v4, %v820_v3 }
 0x84d   :  { %v828_v6 = vmul.f32 0.70710677, %v826_v5  ;;  %v827_v8 = vmul.f32 0.5, %v826_v5 }
 0x84f   :  { %1217 = verf.f32 %v828_v6 }
 0x85c   :  { %v1218_v7 = vpop.eup %1217 }
 0x85d   :  { %v830_v9 = vadd.f32 1.0, %v1218_v7 }
 0x85f   :  { %v831_v10 = vmul.f32 %v830_v9, %v827_v8 }
 0x861   :  { %v832_v11 = vpack.c.bf16 %v831_v10, %v831_v10 }
 0x863   :  { %v839_v12 = vsel %vm56_vm0, %v832_v11, 0 }
 0x864   :  { %1182 = vmatpush3.bf16.msra.mxu1 %v839_v12  ;;  %1188 = vmatpush3.bf16.msra.mxu0 %v839_v12 }
 0x865   :  { %1193 = vmatprep.subr.bf16.mxu1 %v1245_v2 }
 0x867   :  { %1184 = vmatmul.mubr.msk.bf16.vlgmr.msra.gmra.mxu1 %vm52_vm1, %v1063_v13  ;;  %1190 = vmatmul.mubr.msk.bf16.vlgmr.msra.gmra.mxu0 %vm52_vm1, %v1065_v14 }
 0x868   :  { %1194 = vmatpush3.bf16.msra.mxu1 %v839_v12  ;;  %1195 = vmatprep.mubr.msk.bf16.mxu1 %vm1246_vm2, %v1245_v2 }
 0x86f   :  { %1196 = vmatmul.mubr.msk.bf16.vlgmr.msra.gmra.mxu1 %vm52_vm1, %v1067_v15 }
 0x927   :  { %v875_v16 = vpop.f32.mrf.mxu1  ;;  %v920_v17 = vpop.f32.mrf.mxu0 }
 0x928   :  { %971 = vrot.lane.b32.xlu1 %v875_v16, %s1248_s19 }
 0x929   :  { %v1185_v18 = vpop.f32.mrf.mxu1  ;;  %v1191_v19 = vpop.f32.mrf.mxu0 }
 0x92b   :  { %v878_v20 = vpop.f32.mrf.mxu1  ;;  %v923_v21 = vpop.f32.mrf.mxu0 }
 0x92d   :  { %v1186_v22 = vpop.f32.mrf.mxu1  ;;  %v1192_v23 = vpop.f32.mrf.mxu0 }
 0x92f   :  { %v965_v24 = vpop.f32.mrf.mxu1 }
 0x930   :  { %975 = vrot.lane.b32.xlu0 %v965_v24, %s1249_s20 }
 0x931   :  { %v1197_v2 = vpop.f32.mrf.mxu1 }
 0x933   :  { %v968_v25 = vpop.f32.mrf.mxu1 }
 0x935   :  { %v1198_v26 = vpop.f32.mrf.mxu1 }
 0x99a   :  { %v972_v27 = vpop.permute.xlu1 %971 }
 0x99b   :  { %v973_v28 = vmul.f32 %v1391_v58, %v972_v27 }
 0x99d   :  { %v974_v30 = vadd.f32 %v973_v28, %v920_v17 }
 0x9a2   :  { %v976_v29 = vpop.permute.xlu0 %975 }
 0x9a3   :  { %v977_v31 = vmul.f32 %v1397_v61, %v976_v29  ;;  %v1069_v61 = vld [vmem:[%s1526_s10 + $0xc] sm:$0xf]  ;;  %s1223_s10 = scalar_lea.vmem %s1026_s29, 64 }
 0x9a4   :  { %p1224_p0 = scmp.ne.s32.totalorder %s1026_s29, %s1223_s10  ;;  %p1229_p2 = scmp.lt.s32.totalorder %s1223_s10, %s1223_s10 }
 0x9a5   :  { %v978_v32 = vadd.f32 %v977_v31, %v974_v30 }
 0x9a6   :  { %p1230_p3 = por %p1229_p2, %p1228_p1 }
 0x9a7   :  { %v979_v33 = vmul.f32 %v1403_v1, %v978_v32 }
 0x9a8   :  { %p1231_p4 = pnand %p1230_p3, %p1224_p0 }
 0x9a9   :  { %v980_v34 = vsel %vm423_vm3, %v979_v33, 0.0  ;;  %v983_v35 = vmul.f32 %v979_v33, %v979_v33 }
 0x9aa   :  { %981 = vadd.xlane.f32.xlu1 %v980_v34 }
 0x9ab   :  { %v984_v36 = vsel %vm423_vm3, %v983_v35, 0.0 }
 0x9ac   :  { %985 = vadd.xlane.f32.xlu0 %v984_v36 }
 0xa33   :  { %v982_v37 = vpop.xlane.xlu1 %981 }
 0xa34   :  { %v987_v38 = vmul.f32 0.03125, %v982_v37 }
 0xa35   :  { %v986_v39 = vpop.xlane.xlu0 %985 }
 0xa36   :  { %v989_v40 = vmul.f32 %v987_v38, %v987_v38  ;;  %v988_v41 = vmul.f32 0.03125, %v986_v39 }
 0xa38   :  { %v990_v58 = vsub.f32 %v988_v41, %v989_v40 }
 0xa3a   :  { %v991_v42 = vmax.f32 %v990_v58, 0.0 }
 0xa3c   :  { %v994_v43 = vadd.f32 1e-05, %v991_v42 }
 0xa3e   :  { %1219 = vrsqrt.f32 %v994_v43 }
 0xa4b   :  { %v1220_v1 = vpop.eup %1219 }
 0xa4c   :  { %v996_v44 = vmul.f32 %v1220_v1, %v1069_v61 }
 0xa4e   :  { %1003 = vperm.xlu0 %1205, %v996_v44   ;;  %v999_v46 = vmul.f32 %v996_v44, %v987_v38 }
 0xa50   :  { %v1000_v47 = vsub.f32 %v1070_v45, %v999_v46 }
 0xa52   :  { %1009 = vperm.xlu1 %1206, %v1000_v47  }
 0xac9   :  { %v1004_v48 = vpop.permute.xlu0 %1003 }
 0xaca   :  { %v1006_v49 = vmul.f32 %v1004_v48, %v979_v33 }
 0xacd   :  { %v1010_v50 = vpop.permute.xlu1 %1009 }
 0xace   :  { %v1012_v51 = vadd.f32 %v1010_v50, %v1006_v49 }
 0xad0   :  { %v1014_v52 = vmul.f32 0.70710677, %v1012_v51  ;;  %v1013_v54 = vmul.f32 0.5, %v1012_v51 }
 0xad2   :  { %1221 = verf.f32 %v1014_v52 }
 0xadf   :  { %v1222_v53 = vpop.eup %1221 }
 0xae0   :  { %v1016_v55 = vadd.f32 1.0, %v1222_v53 }
 0xae2   :  { %v1017_v56 = vmul.f32 %v1016_v55, %v1013_v54 }
 0xae4   :  { %1018 = vst [vmem:[#allocation2] sm:$0xf] %v1017_v56 }
 0xae5   :  { %1234 = shalt.err (!%p1231_p4)
}
 0xae6   :  { %1028 = dma.vmem_to_hbm [thread:$0]  %s1026_s29, 64, %s1528_s12, [#allocation3]  }
 0xae7   :  { %1243 = dma.done.wait [#allocation3], 64  }
 0xae8   :  { %1244 = vsyncadd [#allocation3], 4294967232 }
 0xae9   :  { %1032 = vsyncpa [#allocation3], 1 }

</bundles_post_ra>
